<compile_context>
chip_gen: v7x
topology: tpu7x:2x2x1
jax: 0.10.0
libtpu: 0.0.40
codegen_flags: <defaults>
</compile_context>

<pallas_src>
import functools
import numpy as np

import jax
import jax.numpy as jnp
from jax.experimental import pallas as pl
from jax.experimental.pallas import tpu as pltpu


# ----------------------------------------------------------------------------- utils
def _round_up(x, m):
    return (x + m - 1) // m * m


def _gelu_tanh(x):
    # TODO(synk): PyTorch nn.GELU default uses exact erf; tanh approximation used here
    # (Mosaic-friendly, EUP path).
    c = jnp.float32(0.7978845608028654)  # sqrt(2/pi)
    return 0.5 * x * (1.0 + jnp.tanh(c * (x + 0.044715 * x * x * x)))


# ----------------------------------------------------------------------------- fused chain kernel
def _chain_kernel(*refs, gelu_flags):
    """refs = (x_ref, w0, b0, w1, b1, ..., o_ref).

    Runs a whole layer chain; the activation never leaves VMEM between layers.
    """
    x = refs[0][...]                                    # f32 [tm, K0]
    o_ref = refs[-1]
    for l, apply_gelu in enumerate(gelu_flags):
        w = refs[1 + 2 * l][...]                        # bf16 [K_l, N_l], resident in VMEM
        b = refs[2 + 2 * l][...]                        # f32  [1, N_l]
        if apply_gelu:
            x = _gelu_tanh(x)                           # GELU kept in f32
        x = jnp.dot(x.astype(w.dtype), w, preferred_element_type=jnp.float32) + b
    o_ref[...] = x


def fused_chain(x2d, weights, biases, gelu_flags):
    """One pallas_call for an entire [GELU?; matmul + bias] chain.

    x2d: [M, K0] f32.  weights[l]: [K_l, N_l] bf16.  biases[l]: [1, N_l] f32.
    Only M is tiled (rows independent); weights/biases use constant index maps.
    Full-array blocks are legal even when not (8,128)-divisible, so no host-side padding.
    """
    x2d = x2d.astype(jnp.float32)
    M, K0 = x2d.shape
    N_out = weights[-1].shape[1]

    tm = M if M <= 512 else 512                         # full block for small M, 512-row tiles else
    grid = (pl.cdiv(M, tm),)

    in_specs = [pl.BlockSpec((tm, K0), lambda i: (i, 0))]
    operands = [x2d]
    flops, transc = 0, 0
    bytes_acc = x2d.size * 4 + M * N_out * 4
    k_prev = K0
    for w, b, g in zip(weights, biases, gelu_flags):
        in_specs.append(pl.BlockSpec(w.shape, lambda i: (0, 0)))
        in_specs.append(pl.BlockSpec(b.shape, lambda i: (0, 0)))
        operands += [w, b]
        flops += 2 * M * w.shape[0] * w.shape[1]
        if g:
            transc += M * k_prev
        bytes_acc += w.size * 2 + b.size * 4
        k_prev = w.shape[1]

    kernel = functools.partial(_chain_kernel, gelu_flags=tuple(bool(g) for g in gelu_flags))
    return pl.pallas_call(
        kernel,
        out_shape=jax.ShapeDtypeStruct((M, N_out), jnp.float32),
        grid=grid,
        in_specs=in_specs,
        out_specs=pl.BlockSpec((tm, N_out), lambda i: (i, 0)),
        compiler_params=pltpu.CompilerParams(dimension_semantics=("parallel",)),
        cost_estimate=pl.CostEstimate(flops=flops, transcendentals=transc,
                                      bytes_accessed=bytes_acc),
    )(*operands)


# ----------------------------------------------------------------------------- effective weights (init-time only)
def _eff_deconv(W, b, s):
    """ConvTranspose1d(kernel=s, stride=s); W:[Cin,Cout,s] -> [Cin, s*Cout] (col = j*Cout + co)."""
    Cin, Cout, _ = W.shape
    return jnp.transpose(W, (0, 2, 1)).reshape(Cin, s * Cout), jnp.tile(b, s)


def _eff_conv1_blockdiag(W, b, s):
    """Conv1d(kernel=1) applied per-position inside a row packing s positions: block-diagonal."""
    Wl = W[:, :, 0].T                                    # [Cin, Cout]
    return jnp.kron(jnp.eye(s, dtype=W.dtype), Wl), jnp.tile(b, s)


def _eff_conv(W, b, s):
    """Conv1d(kernel=s, stride=s); W:[Cout,Cin,s] -> [s*Cin, Cout] (row = k*Cin + ci)."""
    Cout, Cin, _ = W.shape
    return jnp.transpose(W, (2, 1, 0)).reshape(s * Cin, Cout), b


def _eff_block_conv(W, b, s):
    """Strictly-causal within-block conv; W:[Cout,Cin,s] -> [s*Cin, s*Cout]."""
    Cout, Cin, _ = W.shape
    Wt = jnp.transpose(W, (2, 1, 0))                     # [k, Cin, Cout]
    mask = (jnp.arange(s)[:, None] < jnp.arange(s)[None, :]).astype(W.dtype)   # [k, j]: k < j
    W_big = Wt[:, None, :, :] * mask[:, :, None, None]   # [k, j, Cin, Cout]
    return jnp.transpose(W_big, (0, 2, 1, 3)).reshape(s * Cin, s * Cout), jnp.tile(b, s)


def _eff_linear(W, b, pad_to=None):
    """nn.Linear; W:[Cout,Cin] -> [Cin, Cout], optionally lane-padded with zero columns."""
    W_eff, b_eff = W.T, b
    if pad_to is not None and pad_to > W_eff.shape[1]:
        W_eff = jnp.zeros((W_eff.shape[0], pad_to), W.dtype).at[:, : W.shape[0]].set(W_eff)
        b_eff = jnp.zeros((pad_to,), b.dtype).at[: b.shape[0]].set(b_eff)
    return W_eff, b_eff


def _pack(W_eff, b_eff):
    # Weights in bf16 (MXU fast path), biases in f32 of shape [1, N].
    return W_eff.astype(jnp.bfloat16), b_eff.reshape(1, -1).astype(jnp.float32)


# ----------------------------------------------------------------------------- model build
def build_substitution_head(key, num_vocab, embed_dim, head_dim, n_layer, conv_size):
    counter = [0]

    def w(shape):
        counter[0] += 1
        return 0.02 * jax.random.normal(jax.random.fold_in(key, counter[0]), shape, jnp.float32)

    H = head_dim

    # value_embedding = nn.Embedding(num_vocab + 1, head_dim, padding_idx=0)
    embedding = w((num_vocab + 1, H)).at[0].set(0.0)

    def chain(pairs):
        Ws, Bs = zip(*(_pack(We, be) for (We, be) in pairs))
        return {"w": tuple(Ws), "b": tuple(Bs)}

    # deconvolution_1 = [GELU, Deconv(E,H,cs)] + (n_layer-1)*[GELU, Conv(H,H,1)]
    pairs = [_eff_deconv(w((embed_dim, H, conv_size)), w((H,)), conv_size)]
    pairs += [_eff_conv1_blockdiag(w((H, H, 1)), w((H,)), conv_size) for _ in range(n_layer - 1)]
    deconvolution_1 = chain(pairs)

    # deconvolution_0 = [GELU, Deconv(H,H,8)] + (n_layer-1)*[GELU, Conv(H,H,1)]
    pairs = [_eff_deconv(w((H, H, 8)), w((H,)), 8)]
    pairs += [_eff_conv1_blockdiag(w((H, H, 1)), w((H,)), 8) for _ in range(n_layer - 1)]
    deconvolution_0 = chain(pairs)

    # convolution_1 = n_layer * [GELU, BlockConv(H,H,cs)]
    pairs = [_eff_block_conv(w((H, H, conv_size)), w((H,)), conv_size) for _ in range(n_layer)]
    convolution_1 = chain(pairs)

    # convolution_0 = [BlockConv(H,H,8)] + (n_layer-1)*[GELU, BlockConv(H,H,8)]
    pairs = [_eff_block_conv(w((H, H, 8)), w((H,)), 8) for _ in range(n_layer)]
    convolution_0 = chain(pairs)

    # down_convolution = Conv(H,H,8)  (no GELU)
    down_convolution = chain([_eff_conv(w((H, H, 8)), w((H,)), 8)])

    # linear = (n_layer-1)*[GELU, Linear(H,H)] + [GELU, Linear(H, num_vocab)]
    vocab_pad = _round_up(max(num_vocab, 1), 128)        # lane-dense output; slice once at the end
    pairs = [_eff_linear(w((H, H)), w((H,))) for _ in range(n_layer - 1)]
    pairs += [_eff_linear(w((num_vocab, H)), w((num_vocab,)), pad_to=vocab_pad)]
    linear = chain(pairs)

    params = {
        "embedding": embedding,
        "deconvolution_1": deconvolution_1,
        "deconvolution_0": deconvolution_0,
        "convolution_1": convolution_1,
        "convolution_0": convolution_0,
        "down_convolution": down_convolution,
        "linear": linear,
    }
    gelus = {  # static metadata (kept out of the jitted pytree)
        "deconvolution_1": (True,) * n_layer,
        "deconvolution_0": (True,) * n_layer,
        "convolution_1": (True,) * n_layer,
        "convolution_0": (False,) + (True,) * (n_layer - 1),
        "down_convolution": (False,),
        "linear": (True,) * n_layer,
    }

    @jax.jit
    def forward_device(params, x, value_last, mask_1, idx_0):
        B, T2, E = x.shape
        mix_1 = idx_0.shape[1]
        len_1 = mask_1.shape[1]

        def run(name, x2d):
            ch = params[name]
            return fused_chain(x2d, ch["w"], ch["b"], gelus[name])

        # emb_0 = value_embedding(value[:, -len_0:])[:, :mix_1*8]   (padding row 0 is zero)
        emb_0 = jnp.take(params["embedding"], value_last, axis=0)              # [B, mix_1*8, H]

        # emb_1[val_1 == 2] = down_convolution(emb_0)
        dc = run("down_convolution", emb_0.reshape(B * mix_1, 8 * H)).reshape(B, mix_1, H)
        rank = jnp.cumsum(mask_1.astype(jnp.int32), axis=1) - 1
        gathered = jnp.take_along_axis(dc, jnp.maximum(rank, 0)[:, :, None], axis=1)
        emb_1 = jnp.where(mask_1[:, :, None], gathered, 0.0)                   # [B, len_1, H]

        emb_0c = run("convolution_0", emb_0.reshape(B * mix_1, 8 * H)).reshape(B, mix_1 * 8, H)
        emb_1c = run("convolution_1",
                     emb_1.reshape(B * (len_1 // conv_size), conv_size * H)).reshape(B, len_1, H)

        y_1 = run("deconvolution_1", x.reshape(B * T2, E)).reshape(B, T2 * conv_size, H)
        assert y_1.shape == emb_1c.shape
        y_1 = y_1 + emb_1c

        # x_0[i, :n_i] = y_1[i, val_1[i] == 2]
        x_0 = jnp.take_along_axis(y_1, idx_0[:, :, None], axis=1)              # [B, mix_1, H]

        y_0 = run("deconvolution_0", x_0.reshape(B * mix_1, H)).reshape(B, mix_1 * 8, H)
        assert y_0.shape == emb_0c.shape
        y_0 = y_0 + emb_0c

        logits = run("linear", y_0.reshape(B * mix_1 * 8, H))                  # [B*mix_1*8, vocab_pad]
        return logits[:, :num_vocab].reshape(B, mix_1 * 8, num_vocab)

    def forward(params, x, value, depth, pos):
        """x: [N, T'', E]; value/depth: [N, S]; pos unused (spatial_encoding=None)."""
        del pos
        value_np = np.asarray(value)
        depth_np = np.asarray(depth)
        B = value_np.shape[0]

        # data-dependent sequence bookkeeping on host (mirrors the PyTorch reference loops).
        max_depth = int(depth_np.max())
        len_0_arr = (depth_np == max_depth).sum(axis=1)
        len_1_arr = (depth_np == max_depth - 1).sum(axis=1)
        assert (len_0_arr == len_0_arr[0]).all() and (len_1_arr == len_1_arr[0]).all()
        len_0, len_1 = int(len_0_arr[0]), int(len_1_arr[0])
        assert (depth_np[:, -len_0:] == max_depth).all()

        val_1 = np.zeros((B, len_1))
        for i in range(B):
            val_1[i, : len_1_arr[i]] = value_np[i, : len_1_arr[i]]
        mix_arr = (val_1 == 2).sum(axis=1)
        assert (mix_arr == mix_arr[0]).all()
        mix_1 = int(mix_arr[0])

        value_last = value_np[:, -len_0:][:, : mix_1 * 8].astype(np.int32)
        mask_1 = val_1 == 2
        idx_0 = np.zeros((B, mix_1), np.int32)
        for i in range(B):
            idx_0[i] = np.nonzero(mask_1[i])[0][:mix_1]

        return forward_device(params, jnp.asarray(x, jnp.float32),
                              jnp.asarray(value_last), jnp.asarray(mask_1),
                              jnp.asarray(idx_0))

    return params, forward


# ----------------------------------------------------------------------------- main
if __name__ == "__main__":
    num_vocab, embed_dim, head_dim, n_layer, conv_size = 3, 32, 32, 2, 4
    B, T2 = 2, 2
    len_1 = T2 * conv_size          # 8  (penultimate-layer tokens)
    mix_1 = 2                       # mixed tokens (value == 2) per batch row
    len_0 = mix_1 * 8               # 16 (last-layer tokens)
    S = len_1 + len_0

    key = jax.random.PRNGKey(0)
    pkey, xkey, vkey = jax.random.split(key, 3)
    params, forward = build_substitution_head(pkey, num_vocab, embed_dim, head_dim,
                                              n_layer, conv_size)

    x = jax.random.normal(xkey, (B, T2, embed_dim), jnp.float32)
    val_pen = np.array([[1, 2, 3, 1, 2, 3, 1, 1],
                        [2, 1, 1, 3, 1, 2, 3, 1]], dtype=np.int32)   # exactly mix_1 twos / row
    val_last = np.asarray(jax.random.randint(vkey, (B, len_0), 1, num_vocab + 1), np.int32)
    value = np.concatenate([val_pen, val_last], axis=1)
    depth = np.concatenate([np.full((B, len_1), 2, np.int32),
                            np.full((B, len_0), 3, np.int32)], axis=1)
    pos = np.zeros((B, S, 3), np.int32)

    # sanity-check the fused Pallas chain kernel against a plain-jnp reference
    k1, k2, k3, k4, k5 = jax.random.split(jax.random.PRNGKey(1), 5)
    xa = jax.random.normal(k1, (10, 40), jnp.float32)
    w0 = (0.1 * jax.random.normal(k2, (40, 160), jnp.float32)).astype(jnp.bfloat16)
    b0 = 0.1 * jax.random.normal(k3, (1, 160), jnp.float32)
    w1 = (0.1 * jax.random.normal(k4, (160, 96), jnp.float32)).astype(jnp.bfloat16)
    b1 = 0.1 * jax.random.normal(k5, (1, 96), jnp.float32)
    got = fused_chain(xa, (w0, w1), (b0, b1), (True, True))
    ref = _gelu_tanh(xa)
    ref = jnp.dot(ref.astype(jnp.bfloat16), w0, preferred_element_type=jnp.float32) + b0
    ref = _gelu_tanh(ref)
    ref = jnp.dot(ref.astype(jnp.bfloat16), w1, preferred_element_type=jnp.float32) + b1
    np.testing.assert_allclose(np.asarray(got), np.asarray(ref), rtol=1e-2, atol=1e-2)

    logits = forward(params, x, value, depth, pos)
    logits = jax.block_until_ready(logits)
    assert logits.shape == (B, mix_1 * 8, num_vocab), logits.shape
    assert np.all(np.isfinite(np.asarray(logits)))
    print("KERNEL_OK")
</pallas_src>

<mosaic_0001>
module attributes {stable_mosaic.version = 11 : i64} {
  func.func @_chain_kernel(%arg0: i32, %arg1: memref<10x40xf32, #tpu.memory_space<vmem>>, %arg2: memref<40x160xbf16, #tpu.memory_space<vmem>>, %arg3: memref<1x160xf32, #tpu.memory_space<vmem>>, %arg4: memref<160x96xbf16, #tpu.memory_space<vmem>>, %arg5: memref<1x96xf32, #tpu.memory_space<vmem>>, %arg6: memref<10x96xf32, #tpu.memory_space<vmem>>) attributes {dimension_semantics = [#tpu.dimension_semantics<parallel>], iteration_bounds = array<i64: 1>, scalar_prefetch = 0 : i64, scratch_operands = 0 : i64, tpu.core_type = #tpu.core_type<tc>, window_params = [{transform_indices = @transform_0, window_bounds = array<i64: 10, 40>}, {pipeline_mode = #tpu.pipeline_mode<synchronous>, transform_indices = @transform_1, window_bounds = array<i64: 40, 160>}, {pipeline_mode = #tpu.pipeline_mode<synchronous>, transform_indices = @transform_2, window_bounds = array<i64: 1, 160>}, {pipeline_mode = #tpu.pipeline_mode<synchronous>, transform_indices = @transform_3, window_bounds = array<i64: 160, 96>}, {pipeline_mode = #tpu.pipeline_mode<synchronous>, transform_indices = @transform_4, window_bounds = array<i64: 1, 96>}, {transform_indices = @transform_5, window_bounds = array<i64: 10, 96>}]} {
    %c0 = arith.constant 0 : index
    %c0_0 = arith.constant 0 : index
    %0 = vector.load %arg1[%c0, %c0_0] : memref<10x40xf32, #tpu.memory_space<vmem>>, vector<10x40xf32>
    %c0_1 = arith.constant 0 : index
    %c0_2 = arith.constant 0 : index
    %1 = vector.load %arg2[%c0_1, %c0_2] : memref<40x160xbf16, #tpu.memory_space<vmem>>, vector<40x160xbf16>
    %c0_3 = arith.constant 0 : index
    %c0_4 = arith.constant 0 : index
    %2 = vector.load %arg3[%c0_3, %c0_4] : memref<1x160xf32, #tpu.memory_space<vmem>>, vector<1x160xf32>
    %cst = arith.constant 5.000000e-01 : f32
    %3 = vector.broadcast %cst : f32 to vector<10x40xf32>
    %4 = arith.mulf %3, %0 : vector<10x40xf32>
    %cst_5 = arith.constant 4.471500e-02 : f32
    %5 = vector.broadcast %cst_5 : f32 to vector<10x40xf32>
    %6 = arith.mulf %5, %0 : vector<10x40xf32>
    %7 = arith.mulf %6, %0 : vector<10x40xf32>
    %8 = arith.mulf %7, %0 : vector<10x40xf32>
    %9 = arith.addf %0, %8 : vector<10x40xf32>
    %cst_6 = arith.constant 0.797884583 : f32
    %10 = vector.broadcast %cst_6 : f32 to vector<10x40xf32>
    %11 = arith.mulf %10, %9 : vector<10x40xf32>
    %12 = math.tanh %11 : vector<10x40xf32>
    %cst_7 = arith.constant 1.000000e+00 : f32
    %13 = vector.broadcast %cst_7 : f32 to vector<10x40xf32>
    %14 = arith.addf %13, %12 : vector<10x40xf32>
    %15 = arith.mulf %4, %14 : vector<10x40xf32>
    %16 = arith.truncf %15 : vector<10x40xf32> to vector<10x40xbf16>
    %cst_8 = arith.constant dense<0.000000e+00> : vector<10x160xf32>
    %17 = tpu.matmul %16, %1, %cst_8 {dimension_numbers = #tpu.dot_dimension_numbers<[1], [0], [0], [1], [0, 0, 1, 1], [], []>} : vector<10x40xbf16>, vector<40x160xbf16>, vector<10x160xf32> -> vector<10x160xf32>
    %18 = vector.broadcast %2 : vector<1x160xf32> to vector<10x160xf32>
    %19 = arith.addf %17, %18 : vector<10x160xf32>
    %c0_9 = arith.constant 0 : index
    %c0_10 = arith.constant 0 : index
    %20 = vector.load %arg4[%c0_9, %c0_10] : memref<160x96xbf16, #tpu.memory_space<vmem>>, vector<160x96xbf16>
    %c0_11 = arith.constant 0 : index
    %c0_12 = arith.constant 0 : index
    %21 = vector.load %arg5[%c0_11, %c0_12] : memref<1x96xf32, #tpu.memory_space<vmem>>, vector<1x96xf32>
    %cst_13 = arith.constant 5.000000e-01 : f32
    %22 = vector.broadcast %cst_13 : f32 to vector<10x160xf32>
    %23 = arith.mulf %22, %19 : vector<10x160xf32>
    %cst_14 = arith.constant 4.471500e-02 : f32
    %24 = vector.broadcast %cst_14 : f32 to vector<10x160xf32>
    %25 = arith.mulf %24, %19 : vector<10x160xf32>
    %26 = arith.mulf %25, %19 : vector<10x160xf32>
    %27 = arith.mulf %26, %19 : vector<10x160xf32>
    %28 = arith.addf %19, %27 : vector<10x160xf32>
    %cst_15 = arith.constant 0.797884583 : f32
    %29 = vector.broadcast %cst_15 : f32 to vector<10x160xf32>
    %30 = arith.mulf %29, %28 : vector<10x160xf32>
    %31 = math.tanh %30 : vector<10x160xf32>
    %cst_16 = arith.constant 1.000000e+00 : f32
    %32 = vector.broadcast %cst_16 : f32 to vector<10x160xf32>
    %33 = arith.addf %32, %31 : vector<10x160xf32>
    %34 = arith.mulf %23, %33 : vector<10x160xf32>
    %35 = arith.truncf %34 : vector<10x160xf32> to vector<10x160xbf16>
    %cst_17 = arith.constant dense<0.000000e+00> : vector<10x96xf32>
    %36 = tpu.matmul %35, %20, %cst_17 {dimension_numbers = #tpu.dot_dimension_numbers<[1], [0], [0], [1], [0, 0, 1, 1], [], []>} : vector<10x160xbf16>, vector<160x96xbf16>, vector<10x96xf32> -> vector<10x96xf32>
    %37 = vector.broadcast %21 : vector<1x96xf32> to vector<10x96xf32>
    %38 = arith.addf %36, %37 : vector<10x96xf32>
    %c0_18 = arith.constant 0 : index
    %c0_19 = arith.constant 0 : index
    %39 = vector.load %arg6[%c0_18, %c0_19] : memref<10x96xf32, #tpu.memory_space<vmem>>, vector<10x96xf32>
    tpu.vector_store %arg6[%c0_18, %c0_19], %38 {strides = array<i32>} : memref<10x96xf32, #tpu.memory_space<vmem>>, vector<10x96xf32>,
    return
  }
  func.func @transform_0(%arg0: i32) -> (i32, i32) {
    %c0_i32 = arith.constant 0 : i32
    %c0_i32_0 = arith.constant 0 : i32
    return %arg0, %c0_i32 : i32, i32
  }
  func.func @transform_1(%arg0: i32) -> (i32, i32) {
    %c0_i32 = arith.constant 0 : i32
    %c0_i32_0 = arith.constant 0 : i32
    %c0_i32_1 = arith.constant 0 : i32
    return %c0_i32, %c0_i32_0 : i32, i32
  }
  func.func @transform_2(%arg0: i32) -> (i32, i32) {
    %c0_i32 = arith.constant 0 : i32
    %c0_i32_0 = arith.constant 0 : i32
    %c0_i32_1 = arith.constant 0 : i32
    return %c0_i32, %c0_i32_0 : i32, i32
  }
  func.func @transform_3(%arg0: i32) -> (i32, i32) {
    %c0_i32 = arith.constant 0 : i32
    %c0_i32_0 = arith.constant 0 : i32
    %c0_i32_1 = arith.constant 0 : i32
    return %c0_i32, %c0_i32_0 : i32, i32
  }
  func.func @transform_4(%arg0: i32) -> (i32, i32) {
    %c0_i32 = arith.constant 0 : i32
    %c0_i32_0 = arith.constant 0 : i32
    %c0_i32_1 = arith.constant 0 : i32
    return %c0_i32, %c0_i32_0 : i32, i32
  }
  func.func @transform_5(%arg0: i32) -> (i32, i32) {
    %c0_i32 = arith.constant 0 : i32
    %c0_i32_0 = arith.constant 0 : i32
    return %arg0, %c0_i32 : i32, i32
  }
}

</mosaic_0001>

<bundles_post_ra>
// kernel: tpu_custom_call.1
= control target key start
LH: loop header
LB: loop body
LE: loop exit
PB: predicated region body
PF: predicated region fallthrough
CT: control target
= control target key end

     0   :  { %10 = vsyncpa [#allocation3], 0  ;;  %s645_s0 = inlined_call_operand.hbm [shape: f32[10,40], index: 0, kind: input, shape index: {}]   ;;  %s646_s1 = inlined_call_operand.hbm [shape: bf16[40,160], index: 1, kind: input, shape index: {}]   ;;  %s647_s2 = inlined_call_operand.vmem [shape: f32[1,160], index: 2, kind: input, shape index: {}]   ;;  %s648_s3 = inlined_call_operand.hbm [shape: bf16[160,96], index: 3, kind: input, shape index: {}]   ;;  %s649_s4 = inlined_call_operand.vmem [shape: f32[1,96], index: 4, kind: input, shape index: {}]   ;;  %s650_s5 = inlined_call_operand.hbm [shape: f32[10,96], index: 5, kind: output, shape index: {}]  }
   0x1   :  { %11 = vsyncpa [#allocation6], 0 }
   0x2   :  { %12 = vsyncpa [#allocation4], 0  ;;  %s525_s18 = smov [#allocation5]   ;;  %s526_s20 = smov [#allocation2]  }
   0x3   :  { %s30_s19 = sshll.u32 %s525_s18, 4  ;;  %s18_s21 = sshll.u32 %s526_s20, 4  ;;  %s31_s19 = int_to_ptr.vmem [resolvable:$true] %s30_s19  ;;  %s564_s21 = int_to_ptr.vmem [resolvable:$true] %s18_s21 }
   0x4   :  { %s431_s24 = scalar_lea.hbm %s646_s1, 640 }
   0x5   :  { %p432_p0 = scmp.ne.s32.totalorder %s646_s1, %s431_s24  ;;  %p435_p1 = scmp.lt.u32.totalorder %s431_s24, %s646_s1 }
   0x7   :  { %p437_p2 = pnand %p435_p1, %p432_p0 }
   0x9   :  { %440 = shalt.err (!%p437_p2)
}
   0xa   :  { %s441_s29 = scalar_lea.vmem %s31_s19, 640  ;;  %p446_p4 = scmp.lt.s32.totalorder %s31_s19, %s31_s19 }
   0xb   :  { %p442_p3 = scmp.ne.s32.totalorder %s31_s19, %s441_s29  ;;  %p447_p5 = scmp.lt.s32.totalorder %s441_s29, %s441_s29 }
   0xd   :  { %p448_p6 = por %p447_p5, %p446_p4 }
   0xf   :  { %p449_p7 = pnand %p448_p6, %p442_p3 }
  0x11   :  { %452 = shalt.err (!%p449_p7)
}
  0x12   :  { %s527_s30 = smov 128   ;;  %s528_s6 = smov 8  }
  0x13   :  { %36 = dma.hbm_to_vmem [thread:$0]  %s646_s1, 640, %s31_s19, [#allocation6], %s527_s30, %s527_s30, %s528_s6  }
  0x14   :  { %s453_s11 = scalar_lea.hbm %s645_s0, 256 }
  0x15   :  { %p454_p8 = scmp.ne.s32.totalorder %s645_s0, %s453_s11  ;;  %p457_p9 = scmp.lt.u32.totalorder %s453_s11, %s645_s0 }
  0x17   :  { %p459_p10 = pnand %p457_p9, %p454_p8 }
  0x19   :  { %462 = shalt.err (!%p459_p10)
}
  0x1a   :  { %s463_s16 = scalar_lea.vmem %s564_s21, 256  ;;  %p468_p12 = scmp.lt.s32.totalorder %s564_s21, %s564_s21 }
  0x1b   :  { %p464_p11 = scmp.ne.s32.totalorder %s564_s21, %s463_s16  ;;  %p469_p13 = scmp.lt.s32.totalorder %s463_s16, %s463_s16 }
  0x1d   :  { %p470_p0 = por %p469_p13, %p468_p12 }
  0x1f   :  { %p471_p1 = pnand %p470_p0, %p464_p11 }
  0x21   :  { %474 = shalt.err (!%p471_p1)
}
  0x22   :  { %24 = dma.hbm_to_vmem [thread:$0]  %s645_s0, 256, %s564_s21, [#allocation3], %s527_s30, %s527_s30, %s528_s6  }
  0x23   :  { %s529_s18 = smov [#allocation7]   ;;  %s475_s23 = scalar_lea.hbm %s648_s3, 1280 }
  0x24   :  { %s44_s19 = sshll.u32 %s529_s18, 4  ;;  %p476_p2 = scmp.ne.s32.totalorder %s648_s3, %s475_s23  ;;  %s45_s19 = int_to_ptr.vmem [resolvable:$true] %s44_s19 }
  0x25   :  { %p479_p3 = scmp.lt.u32.totalorder %s475_s23, %s648_s3 }
  0x27   :  { %p481_p4 = pnand %p479_p3, %p476_p2 }
  0x29   :  { %484 = shalt.err (!%p481_p4)
}
  0x2a   :  { %s485_s28 = scalar_lea.vmem %s45_s19, 1280  ;;  %p490_p6 = scmp.lt.s32.totalorder %s45_s19, %s45_s19 }
  0x2b   :  { %p486_p5 = scmp.ne.s32.totalorder %s45_s19, %s485_s28  ;;  %p491_p7 = scmp.lt.s32.totalorder %s485_s28, %s485_s28 }
  0x2d   :  { %p492_p8 = por %p491_p7, %p490_p6 }
  0x2f   :  { %p493_p9 = pnand %p492_p8, %p486_p5 }
  0x31   :  { %496 = shalt.err (!%p493_p9)
}
  0x32   :  { %s530_s0 = smov 64   ;;  %s531_s21 = smov 4  }
  0x33   :  { %50 = dma.hbm_to_vmem [thread:$0]  %s648_s3, 1280, %s45_s19, [#allocation6], %s530_s0, %s530_s0, %s531_s21  }
  0x34   :  { %519 = dma.done.wait [#allocation3], 256  }
  0x35   :  { %520 = vsyncadd [#allocation3], 4294967040 }
  0x36   :  { %521 = dma.done.wait [#allocation6], 1920  }
  0x37   :  { %522 = vsyncadd [#allocation6], 4294965376  ;;  %v532_v0 = vmov 0   ;;  %v401_v1 = vld [vmem:[#allocation5 + $0x4] ss:$8 sps:$4 sm:$0xff]   ;;  %vm130_vm0 = vcmask 1043456   ;;  %v91_v40 = vlaneseq }
  0x38   :  { %169 = vmatprep.mubr.bf16.mxu0 %v532_v0  ;;  %309 = vmatprep.subr.bf16.mxu1 %v532_v0  ;;  %v403_v2 = vld [vmem:[#allocation5] ss:$8 sps:$4 sm:$0xff]   ;;  %v404_v3 = vld [vmem:[#allocation5 + $0x14] ss:$8 sps:$4 sm:$0xff]   ;;  %v406_v4 = vld [vmem:[#allocation5 + $0x10] ss:$8 sps:$4 sm:$0xff]  }
  0x39   :  { %137 = vmatprep.subr.bf16.mxu0 %v401_v1  ;;  %v69_v5 = vld [vmem:[#allocation5 + $0x20] sm:$0xff]  ;;  %v63_v7 = vld [vmem:[#allocation2] sm:$0xff]  ;;  %v64_v8 = vld [vmem:[#allocation2 + $0x8] sm:$0x3]  ;;  %vm126_vm1 = vcmask 326656   ;;  %v92_v41 = vshrl.u32 %v91_v40, 7 }
  0x3a   :  { %138 = vmatpush1.bf16.msra.mxu0 %v403_v2  ;;  %v376_v6 = vcombine.low %v69_v5, %v69_v5  ;;  %v377_v9 = vcombine.high %v69_v5, %v69_v5  ;;  %v73_v10 = vmul.f32 0.044715, %v63_v7  ;;  %v74_v11 = vmul.f32 0.044715, %v64_v8  ;;  %v409_v12 = vld [vmem:[#allocation7] sm:$0xff]   ;;  %v410_v16 = vld [vmem:[#allocation7 + $0x8] sm:$0xff]  }
  0x3b   :  { %139 = vmatprep.subr.bf16.mxu0 %v404_v3  ;;  %310 = vmatpush1.bf16.msra.mxu1 %v409_v12  ;;  %v71_v23 = vmul.f32 0.5, %v63_v7  ;;  %v72_v25 = vmul.f32 0.5, %v64_v8  ;;  %v411_v32 = vld [vmem:[#allocation7 + $0x10] sm:$0xff]   ;;  %v412_v33 = vld [vmem:[#allocation7 + $0x18] sm:$0xff]   ;;  %v413_v34 = vld [vmem:[#allocation7 + $0x20] sm:$0xff]   ;;  %v93_v42 = vsub.s32 0, %v92_v41 }
  0x3c   :  { %v132_v13 = vsel %vm130_vm0, %v376_v6, 0  ;;  %v75_v14 = vmul.f32 %v73_v10, %v63_v7  ;;  %v76_v15 = vmul.f32 %v74_v11, %v64_v8  ;;  %311 = vmatprep.subr.bf16.mxu1 %v532_v0  ;;  %v414_v35 = vld [vmem:[#allocation7 + $0x28] sm:$0xff]   ;;  %v415_v36 = vld [vmem:[#allocation7 + $0x30] sm:$0xff]   ;;  %v416_v37 = vld [vmem:[#allocation7 + $0x38] sm:$0xff]   ;;  %v97_v44 = vsub.s32 1, %v92_v41  ;;  %s533_s10 = smov [#allocation8]  }
  0x3d   :  { %v417_v38 = vld [vmem:[#allocation7 + $0x40] sm:$0xff]   ;;  %v418_v39 = vld [vmem:[#allocation7 + $0x48] sm:$0xff]   ;;  %vm305_vm2 = vcmask 261120   ;;  %vm350_vm3 = vcmask 785408   ;;  %s359_s11 = sshll.u32 %s533_s10, 4  ;;  %vm352_vm4 = vcmask 779264   ;;  %s360_s11 = int_to_ptr.vmem [resolvable:$true] %s359_s11 }
  0x3e   :  { %140 = vmatpush1.bf16.msra.mxu0 %v406_v4  ;;  %v77_v17 = vmul.f32 %v75_v14, %v63_v7  ;;  %v78_v18 = vmul.f32 %v76_v15, %v64_v8  ;;  %v70_v43 = vld [vmem:[%s647_s2] sm:$0x3]  ;;  %s497_s12 = scalar_lea.vmem %s360_s11, 256  ;;  %p502_p11 = scmp.lt.s32.totalorder %s360_s11, %s360_s11 }
  0x3f   :  { %378 = vmatprep.subr.msk.bf16.mxu0 %vm130_vm0, %v377_v9  ;;  %312 = vmatpush1.bf16.msra.mxu1 %v410_v16  ;;  %v94_v45 = vrot.slane %v70_v43, %v93_v42  ;;  %v98_v46 = vrot.slane %v70_v43, %v97_v44  ;;  %p498_p10 = scmp.ne.s32.totalorder %s360_s11, %s497_s12  ;;  %p503_p12 = scmp.lt.s32.totalorder %s497_s12, %s497_s12 }
  0x40   :  { %v79_v19 = vadd.f32 %v77_v17, %v63_v7  ;;  %v80_v20 = vadd.f32 %v78_v18, %v64_v8  ;;  %313 = vmatprep.subr.bf16.mxu1 %v532_v0 }
  0x41   :  { %p504_p13 = por %p503_p12, %p502_p11 }
  0x42   :  { %142 = vmatpush1.bf16.msra.mxu0 %v132_v13  ;;  %v81_v21 = vmul.f32 0.7978846, %v79_v19  ;;  %v82_v22 = vmul.f32 0.7978846, %v80_v20 }
  0x43   :  { %314 = vmatpush1.bf16.msra.mxu1 %v411_v32  ;;  %p505_p0 = pnand %p504_p13, %p498_p10 }
  0x44   :  { %419 = vtanh.f32 %v81_v21  ;;  %315 = vmatprep.subr.bf16.mxu1 %v532_v0 }
  0x45   :  { %421 = vtanh.f32 %v82_v22 }
  0x47   :  { %316 = vmatpush1.bf16.msra.mxu1 %v412_v33 }
  0x48   :  { %317 = vmatprep.subr.bf16.mxu1 %v532_v0 }
  0x4b   :  { %318 = vmatpush1.bf16.msra.mxu1 %v413_v34 }
  0x4c   :  { %319 = vmatprep.subr.bf16.mxu1 %v532_v0 }
  0x4e   :  { %v420_v24 = vpop.eup %419 }
  0x4f   :  { %v422_v26 = vpop.eup %421  ;;  %v85_v27 = vadd.f32 1.0, %v420_v24  ;;  %320 = vmatpush1.bf16.msra.mxu1 %v414_v35 }
  0x50   :  { %v86_v28 = vadd.f32 1.0, %v422_v26  ;;  %321 = vmatprep.subr.bf16.mxu1 %v532_v0 }
  0x51   :  { %v87_v29 = vmul.f32 %v85_v27, %v71_v23 }
  0x52   :  { %v88_v30 = vmul.f32 %v86_v28, %v72_v25 }
  0x53   :  { %322 = vmatpush1.bf16.msra.mxu1 %v415_v36 }
  0x54   :  { %v89_v31 = vpack.c.bf16 %v88_v30, %v87_v29  ;;  %323 = vmatprep.subr.bf16.mxu1 %v532_v0  ;;  %v380_v29 = vld [vmem:[%s649_s4] ss:$0 sm:$0xff] }
  0x56   :  { %379 = vmatmul.mubr.msk.bf16.vlgmr.msra.gmra.mrb[0].mxu0 %vm126_vm1, %v89_v31 }
  0x57   :  { %324 = vmatpush1.bf16.msra.mxu1 %v416_v37 }
  0x58   :  { %325 = vmatprep.subr.bf16.mxu1 %v532_v0 }
  0x5b   :  { %326 = vmatpush1.bf16.msra.mxu1 %v417_v38 }
  0x5c   :  { %327 = vmatprep.subr.bf16.mxu1 %v532_v0 }
  0x5f   :  { %328 = vmatpush1.bf16.msra.mxu1 %v418_v39 }
 0x129   :  { %v171_v47 = vpop.f32.mrb[0].mxu0 }
 0x12a   :  { %v172_v48 = vadd.f32 %v171_v47, %v94_v45  ;;  %v173_v49 = vpop.f32.mrb[1].mxu0 }
 0x12b   :  { %v174_v50 = vadd.f32 %v173_v49, %v98_v46  ;;  %v175_v51 = vpop.f32.mrb[2].mxu0 }
 0x12c   :  { %v205_v52 = vmul.f32 0.044715, %v172_v48  ;;  %v176_v53 = vadd.f32 %v175_v51, %v94_v45  ;;  %v177_v54 = vpop.f32.mrb[3].mxu0  ;;  %v201_v17 = vmul.f32 0.5, %v172_v48 }
 0x12d   :  { %v206_v55 = vmul.f32 0.044715, %v174_v50  ;;  %v178_v56 = vadd.f32 %v177_v54, %v98_v46  ;;  %v202_v20 = vmul.f32 0.5, %v174_v50 }
 0x12e   :  { %v209_v57 = vmul.f32 %v205_v52, %v172_v48  ;;  %v207_v58 = vmul.f32 0.044715, %v176_v53  ;;  %v203_v18 = vmul.f32 0.5, %v176_v53 }
 0x12f   :  { %v210_v59 = vmul.f32 %v206_v55, %v174_v50  ;;  %v208_v60 = vmul.f32 0.044715, %v178_v56  ;;  %v204_v21 = vmul.f32 0.5, %v178_v56 }
 0x130   :  { %v213_v61 = vmul.f32 %v209_v57, %v172_v48  ;;  %v211_v62 = vmul.f32 %v207_v58, %v176_v53 }
 0x131   :  { %v212_v63 = vmul.f32 %v208_v60, %v178_v56  ;;  %v214_v0 = vmul.f32 %v210_v59, %v174_v50 }
 0x132   :  { %v215_v1 = vmul.f32 %v211_v62, %v176_v53  ;;  %v217_v2 = vadd.f32 %v213_v61, %v172_v48 }
 0x133   :  { %v216_v3 = vmul.f32 %v212_v63, %v178_v56  ;;  %v218_v4 = vadd.f32 %v214_v0, %v174_v50 }
 0x134   :  { %v219_v5 = vadd.f32 %v215_v1, %v176_v53  ;;  %v221_v6 = vmul.f32 0.7978846, %v217_v2 }
 0x135   :  { %v220_v7 = vadd.f32 %v216_v3, %v178_v56  ;;  %v222_v8 = vmul.f32 0.7978846, %v218_v4 }
 0x136   :  { %v223_v9 = vmul.f32 0.7978846, %v219_v5  ;;  %423 = vtanh.f32 %v221_v6 }
 0x137   :  { %v224_v10 = vmul.f32 0.7978846, %v220_v7  ;;  %425 = vtanh.f32 %v222_v8 }
 0x138   :  { %427 = vtanh.f32 %v223_v9 }
 0x139   :  { %429 = vtanh.f32 %v224_v10 }
 0x140   :  { %v424_v11 = vpop.eup %423 }
 0x141   :  { %v426_v12 = vpop.eup %425  ;;  %v229_v13 = vadd.f32 1.0, %v424_v11 }
 0x142   :  { %v428_v14 = vpop.eup %427  ;;  %v230_v15 = vadd.f32 1.0, %v426_v12 }
 0x143   :  { %v430_v16 = vpop.eup %429  ;;  %v231_v19 = vadd.f32 1.0, %v428_v14  ;;  %v233_v23 = vmul.f32 %v229_v13, %v201_v17 }
 0x144   :  { %v232_v22 = vadd.f32 1.0, %v430_v16  ;;  %v234_v25 = vmul.f32 %v230_v15, %v202_v20 }
 0x145   :  { %v235_v24 = vmul.f32 %v231_v19, %v203_v18 }
 0x146   :  { %v236_v26 = vmul.f32 %v232_v22, %v204_v21 }
 0x147   :  { %v237_v27 = vpack.c.bf16 %v235_v24, %v233_v23 }
 0x148   :  { %v238_v28 = vpack.c.bf16 %v236_v26, %v234_v25 }
 0x14a   :  { %391 = vmatprep.mubr.msk.bf16.mxu1 %vm305_vm2, %v238_v28 }
 0x14b   :  { %342 = vmatmul.mubr.bf16.vlgmr.msra.gmra.mrb[0].mxu1 %v237_v27 }
 0x21e   :  { %v343_v30 = vpop.f32.mrb[0].mxu1 }
 0x21f   :  { %v344_v31 = vadd.f32 %v380_v29, %v343_v30  ;;  %v345_v32 = vpop.f32.mrb[1].mxu1 }
 0x220   :  { %v346_v33 = vpop.f32.mrb[2].mxu1 }
 0x221   :  { %v347_v34 = vadd.f32 %v380_v29, %v346_v33  ;;  %v348_v35 = vpop.f32.mrb[3].mxu1  ;;  %351 = vst.msk [vmem:[#allocation8] sm:$0xff] %vm350_vm3, %v344_v31 }
 0x223   :  { %353 = vst.msk [vmem:[#allocation8 + $0x8] sm:$0x3] %vm352_vm4, %v347_v34 }
 0x224   :  { %508 = shalt.err (!%p505_p0)
}
 0x225   :  { %s509_s14 = scalar_lea.hbm %s650_s5, 256 }
 0x226   :  { %p510_p1 = scmp.ne.s32.totalorder %s650_s5, %s509_s14  ;;  %p513_p2 = scmp.lt.u32.totalorder %s509_s14, %s650_s5 }
 0x228   :  { %p515_p3 = pnand %p513_p2, %p510_p1 }
 0x22a   :  { %518 = shalt.err (!%p515_p3)
}
 0x22b   :  { %365 = dma.vmem_to_hbm [thread:$0]  %s360_s11, 256, %s650_s5, [#allocation4], %s527_s30, %s527_s30, %s528_s6  }
 0x22c   :  { %523 = dma.done.wait [#allocation4], 256  }
 0x22d   :  { %524 = vsyncadd [#allocation4], 4294967040 }
 0x22e   :  { %369 = vsyncpa [#allocation3], 1 }
 0x22f   :  { %370 = vsyncpa [#allocation6], 1 }
 0x230   :  { %371 = vsyncpa [#allocation4], 1 }

</bundles_post_ra>
